<compile_context>
chip_gen: v6e
topology: v6e:2x2x1
jax: 0.10.0
libtpu: 0.0.40
codegen_flags: <defaults>
</compile_context>

<pallas_src>
import jax
import jax.numpy as jnp
from jax.experimental import pallas as pl
from jax.experimental.pallas import tpu as pltpu

LEAKY_SLOPE = 0.01  # torch.nn.LeakyReLU default
LANE = 128
SUBLANE = 8


def _leaky_relu(x):
    return jnp.where(x >= 0, x, LEAKY_SLOPE * x)


def _round_up(x, m):
    return ((x + m - 1) // m) * m


def _mlp_kernel(x_ref, w1_ref, b1_ref, w2_ref, b2_ref, w3_ref, b3_ref, o_ref):
    # Layers 1 & 2: MXU matmuls with f32 accumulation; bias + LeakyReLU on VPU.
    x = x_ref[...].astype(w1_ref.dtype)            # no-op for f32; VPU cast for bf16 path
    h1 = jnp.dot(x, w1_ref[...], preferred_element_type=jnp.float32)
    h1 = _leaky_relu(h1 + b1_ref[...])

    h2 = jnp.dot(h1.astype(w2_ref.dtype), w2_ref[...],
                 preferred_element_type=jnp.float32)
    h2 = _leaky_relu(h2 + b2_ref[...])

    # Final layer has a single output column: VPU multiply + XLU lane reduction
    # instead of an MXU matmul with one output column.  b3 comes from SMEM.
    val = jnp.sum(h2 * w3_ref[...], axis=-1, keepdims=True) + b3_ref[0, 0]

    # Narrow (block_b, 1) store: vastly less HBM write traffic than a 128-wide
    # broadcast slab, and no wrapper-side slice afterwards.
    o_ref[...] = val.astype(o_ref.dtype)


def prepare_state_value_params(params, *, use_bf16=False):
    """One-time param prep: pad hidden dim to the 128-lane width and optionally
    cast MXU operands to bf16.  Call once (at init / after each optimizer step)
    and reuse the result; keeps the per-forward path free of pad/cast ops.

    Zero padding is exact: padded hidden columns see zero weights/biases,
    LeakyReLU(0) == 0, and padded w3 entries contribute nothing to the sum.
    """
    w1, b1, w2, b2, w3, b3 = params
    d_state, n_hidden = w1.shape
    h_pad = _round_up(n_hidden, LANE)

    w1p = jnp.zeros((d_state, h_pad), jnp.float32).at[:, :n_hidden].set(w1)
    b1p = jnp.zeros((1, h_pad), jnp.float32).at[:, :n_hidden].set(jnp.reshape(b1, (1, -1)))
    w2p = jnp.zeros((h_pad, h_pad), jnp.float32).at[:n_hidden, :n_hidden].set(w2)
    b2p = jnp.zeros((1, h_pad), jnp.float32).at[:, :n_hidden].set(jnp.reshape(b2, (1, -1)))
    w3p = jnp.zeros((1, h_pad), jnp.float32).at[:, :n_hidden].set(jnp.reshape(w3, (1, -1)))
    b3p = jnp.reshape(jnp.asarray(b3, jnp.float32), (1, 1))

    if use_bf16:
        # bf16 MXU operands (halves weight DMA); accumulation/epilogue stay f32.
        w1p = w1p.astype(jnp.bfloat16)
        w2p = w2p.astype(jnp.bfloat16)
    return (w1p, b1p, w2p, b2p, w3p, b3p)


def state_value_forward(state, prepared_params, *, block_b=None):
    """state: [B, d_state] float32 (or bfloat16).  Returns [B, 1] float32.

    `prepared_params` must come from prepare_state_value_params().
    """
    w1p, b1p, w2p, b2p, w3p, b3p = prepared_params
    B, d_state = state.shape
    assert w1p.shape[0] == d_state, "state feature dim mismatch with params"
    h_pad = w1p.shape[1]

    # --- batch tiling: no padding copy, ragged last block handled by Pallas ---
    if block_b is None:
        if B <= 256:
            # Single grid step: no per-step pipeline overhead for small batches.
            block_b = _round_up(max(B, SUBLANE), SUBLANE)
        else:
            # >= 2 blocks so v7x's two TensorCores shard the 'parallel' axis;
            # cap at 1024 rows (amortizes ~0.35us/step on single-TC v5e/v6e
            # while keeping VMEM trivially small).
            block_b = min(_round_up(-(-B // 2), SUBLANE), 1024)
    num_blocks = pl.cdiv(B, block_b)

    def rep(shape):
        # Grid-invariant operand (weights / biases): constant block index, so
        # Pallas fetches it once and never re-DMAs it across grid steps.
        # TODO(synk): on v7x with n_hidden scaled up, request single buffering
        # (pipeline_mode=pl.Buffered(1)) for these and set vmem_limit_bytes to
        # keep headroom under the 64 MiB VMEM.
        return pl.BlockSpec(shape, lambda i: (0, 0))

    out = pl.pallas_call(
        _mlp_kernel,
        out_shape=jax.ShapeDtypeStruct((B, 1), jnp.float32),
        grid_spec=pltpu.PrefetchScalarGridSpec(
            num_scalar_prefetch=0,
            grid=(num_blocks,),
            in_specs=[
                pl.BlockSpec((block_b, d_state), lambda i: (i, 0)),
                rep((d_state, h_pad)), rep((1, h_pad)),
                rep((h_pad, h_pad)), rep((1, h_pad)),
                rep((1, h_pad)),
                pl.BlockSpec(memory_space=pltpu.MemorySpace.SMEM),  # b3 scalar
            ],
            out_specs=pl.BlockSpec((block_b, 1), lambda i: (i, 0)),
        ),
        compiler_params=pltpu.CompilerParams(
            dimension_semantics=("parallel",)),
    )(state, w1p, b1p, w2p, b2p, w3p, b3p)
    return out


def init_state_value_params(key, d_state, n_hidden):
    """Mirrors init_weights(): orthogonal weights, zero biases.

    PyTorch Linear weight is [out, in]; we orthogonally init that shape and
    transpose to [in, out] for the kernel layout.
    """
    k1, k2, k3 = jax.random.split(key, 3)
    ortho = jax.nn.initializers.orthogonal()

    w1 = ortho(k1, (n_hidden, d_state), jnp.float32).T          # [d_state, n_hidden]
    b1 = jnp.zeros((1, n_hidden), jnp.float32)
    w2 = ortho(k2, (n_hidden, n_hidden), jnp.float32).T         # [n_hidden, n_hidden]
    b2 = jnp.zeros((1, n_hidden), jnp.float32)
    w3 = ortho(k3, (1, n_hidden), jnp.float32).T                # [n_hidden, 1]
    b3 = jnp.zeros((1, 1), jnp.float32)
    return (w1, b1, w2, b2, w3, b3)


def reference_forward(state, params):
    w1, b1, w2, b2, w3, b3 = params
    hp = jax.lax.Precision.HIGHEST
    h1 = _leaky_relu(jnp.dot(state, w1, precision=hp) + b1.reshape(1, -1))
    h2 = _leaky_relu(jnp.dot(h1, w2, precision=hp) + b2.reshape(1, -1))
    return jnp.dot(h2, w3, precision=hp) + b3.reshape(1, 1)


if __name__ == "__main__":
    d_state, n_hidden, batch = 16, 32, 16

    key = jax.random.PRNGKey(0)
    k_param, k_state = jax.random.split(key)

    params = init_state_value_params(k_param, d_state, n_hidden)
    state = jax.random.normal(k_state, (batch, d_state), dtype=jnp.float32)

    # One-time param prep (padding hoisted out of the per-call path).
    prepped = prepare_state_value_params(params)

    out = jax.block_until_ready(state_value_forward(state, prepped))
    ref = reference_forward(state, params)
    assert out.shape == (batch, 1)
    assert jnp.allclose(out, ref, atol=1e-4, rtol=1e-4), "mismatch vs reference"

    # Ragged batch: partial last block, no padding copy (rows are independent,
    # so garbage in the OOB part of the block only touches discarded rows).
    state2 = jax.random.normal(jax.random.PRNGKey(1), (batch + 3, d_state),
                               dtype=jnp.float32)
    out2 = jax.block_until_ready(state_value_forward(state2, prepped))
    ref2 = reference_forward(state2, params)
    assert out2.shape == (batch + 3, 1)
    assert jnp.allclose(out2, ref2, atol=1e-4, rtol=1e-4), "ragged mismatch"

    # Larger batch exercises the multi-block (>= 2 grid steps) path.
    stateL = jax.random.normal(jax.random.PRNGKey(2), (600, d_state),
                               dtype=jnp.float32)
    outL = jax.block_until_ready(state_value_forward(stateL, prepped))
    refL = reference_forward(stateL, params)
    assert outL.shape == (600, 1)
    assert jnp.allclose(outL, refL, atol=1e-4, rtol=1e-4), "multi-block mismatch"

    # bf16 MXU-operand path (cast at prep time); looser tolerance vs f32 ref.
    prepped_bf16 = prepare_state_value_params(params, use_bf16=True)
    out3 = jax.block_until_ready(state_value_forward(state, prepped_bf16))
    assert out3.shape == (batch, 1)
    assert jnp.allclose(out3, ref, atol=5e-2, rtol=5e-2), "bf16 mismatch"

    print("KERNEL_OK")
</pallas_src>

<mosaic_0001>
module attributes {stable_mosaic.version = 11 : i64} {
  func.func @_mlp_kernel(%arg0: i32, %arg1: memref<16x16xf32, #tpu.memory_space<vmem>>, %arg2: memref<16x128xf32, #tpu.memory_space<vmem>>, %arg3: memref<1x128xf32, #tpu.memory_space<vmem>>, %arg4: memref<128x128xf32, #tpu.memory_space<vmem>>, %arg5: memref<1x128xf32, #tpu.memory_space<vmem>>, %arg6: memref<1x128xf32, #tpu.memory_space<vmem>>, %arg7: memref<1x1xf32, #tpu.memory_space<smem>>, %arg8: memref<16x1xf32, #tpu.memory_space<vmem>>) attributes {dimension_semantics = [#tpu.dimension_semantics<parallel>], iteration_bounds = array<i64: 1>, scalar_prefetch = 0 : i64, scratch_operands = 0 : i64, tpu.core_type = #tpu.core_type<tc>, window_params = [{transform_indices = @transform_0, window_bounds = array<i64: 16, 16>}, {pipeline_mode = #tpu.pipeline_mode<synchronous>, transform_indices = @transform_1, window_bounds = array<i64: 16, 128>}, {pipeline_mode = #tpu.pipeline_mode<synchronous>, transform_indices = @transform_2, window_bounds = array<i64: 1, 128>}, {pipeline_mode = #tpu.pipeline_mode<synchronous>, transform_indices = @transform_3, window_bounds = array<i64: 128, 128>}, {pipeline_mode = #tpu.pipeline_mode<synchronous>, transform_indices = @transform_4, window_bounds = array<i64: 1, 128>}, {pipeline_mode = #tpu.pipeline_mode<synchronous>, transform_indices = @transform_5, window_bounds = array<i64: 1, 128>}, {transform_indices = @transform_6, window_bounds = array<i64: 1, 1>}, {transform_indices = @transform_7, window_bounds = array<i64: 16, 1>}]} {
    %c0 = arith.constant 0 : index
    %c0_0 = arith.constant 0 : index
    %0 = vector.load %arg1[%c0, %c0_0] : memref<16x16xf32, #tpu.memory_space<vmem>>, vector<16x16xf32>
    %c0_1 = arith.constant 0 : index
    %c0_2 = arith.constant 0 : index
    %1 = vector.load %arg2[%c0_1, %c0_2] : memref<16x128xf32, #tpu.memory_space<vmem>>, vector<16x128xf32>
    %cst = arith.constant dense<0.000000e+00> : vector<16x128xf32>
    %2 = tpu.matmul %0, %1, %cst {dimension_numbers = #tpu.dot_dimension_numbers<[1], [0], [0], [1], [0, 0, 1, 1], [], []>} : vector<16x16xf32>, vector<16x128xf32>, vector<16x128xf32> -> vector<16x128xf32>
    %c0_3 = arith.constant 0 : index
    %c0_4 = arith.constant 0 : index
    %3 = vector.load %arg3[%c0_3, %c0_4] : memref<1x128xf32, #tpu.memory_space<vmem>>, vector<1x128xf32>
    %4 = vector.broadcast %3 : vector<1x128xf32> to vector<16x128xf32>
    %5 = arith.addf %2, %4 : vector<16x128xf32>
    %cst_5 = arith.constant 0.000000e+00 : f32
    %6 = vector.broadcast %cst_5 : f32 to vector<16x128xf32>
    %7 = arith.cmpf oge, %5, %6 : vector<16x128xf32>
    %cst_6 = arith.constant 0.00999999977 : f32
    %8 = vector.broadcast %cst_6 : f32 to vector<16x128xf32>
    %9 = arith.mulf %8, %5 : vector<16x128xf32>
    %10 = arith.select %7, %5, %9 : vector<16x128xi1>, vector<16x128xf32>
    %c0_7 = arith.constant 0 : index
    %c0_8 = arith.constant 0 : index
    %11 = vector.load %arg4[%c0_7, %c0_8] : memref<128x128xf32, #tpu.memory_space<vmem>>, vector<128x128xf32>
    %cst_9 = arith.constant dense<0.000000e+00> : vector<16x128xf32>
    %12 = tpu.matmul %10, %11, %cst_9 {dimension_numbers = #tpu.dot_dimension_numbers<[1], [0], [0], [1], [0, 0, 1, 1], [], []>} : vector<16x128xf32>, vector<128x128xf32>, vector<16x128xf32> -> vector<16x128xf32>
    %c0_10 = arith.constant 0 : index
    %c0_11 = arith.constant 0 : index
    %13 = vector.load %arg5[%c0_10, %c0_11] : memref<1x128xf32, #tpu.memory_space<vmem>>, vector<1x128xf32>
    %14 = vector.broadcast %13 : vector<1x128xf32> to vector<16x128xf32>
    %15 = arith.addf %12, %14 : vector<16x128xf32>
    %cst_12 = arith.constant 0.000000e+00 : f32
    %16 = vector.broadcast %cst_12 : f32 to vector<16x128xf32>
    %17 = arith.cmpf oge, %15, %16 : vector<16x128xf32>
    %cst_13 = arith.constant 0.00999999977 : f32
    %18 = vector.broadcast %cst_13 : f32 to vector<16x128xf32>
    %19 = arith.mulf %18, %15 : vector<16x128xf32>
    %20 = arith.select %17, %15, %19 : vector<16x128xi1>, vector<16x128xf32>
    %c0_14 = arith.constant 0 : index
    %c0_15 = arith.constant 0 : index
    %21 = vector.load %arg6[%c0_14, %c0_15] : memref<1x128xf32, #tpu.memory_space<vmem>>, vector<1x128xf32>
    %22 = vector.broadcast %21 : vector<1x128xf32> to vector<16x128xf32>
    %23 = arith.mulf %20, %22 : vector<16x128xf32>
    %cst_16 = arith.constant dense<0.000000e+00> : vector<16xf32>
    %24 = vector.multi_reduction <add>, %23, %cst_16 [1] : vector<16x128xf32> to vector<16xf32>
    %25 = vector.shape_cast %24 : vector<16xf32> to vector<16x1xf32>
    %c0_17 = arith.constant 0 : index
    %c0_18 = arith.constant 0 : index
    %26 = memref.load %arg7[%c0_17, %c0_18] : memref<1x1xf32, #tpu.memory_space<smem>>
    %27 = vector.broadcast %26 : f32 to vector<16x1xf32>
    %28 = arith.addf %25, %27 : vector<16x1xf32>
    %c0_19 = arith.constant 0 : index
    %c0_20 = arith.constant 0 : index
    %29 = vector.load %arg8[%c0_19, %c0_20] : memref<16x1xf32, #tpu.memory_space<vmem>>, vector<16x1xf32>
    tpu.vector_store %arg8[%c0_19, %c0_20], %28 {strides = array<i32>} : memref<16x1xf32, #tpu.memory_space<vmem>>, vector<16x1xf32>,
    return
  }
  func.func @transform_0(%arg0: i32) -> (i32, i32) {
    %c0_i32 = arith.constant 0 : i32
    %c0_i32_0 = arith.constant 0 : i32
    return %arg0, %c0_i32 : i32, i32
  }
  func.func @transform_1(%arg0: i32) -> (i32, i32) {
    %c0_i32 = arith.constant 0 : i32
    %c0_i32_0 = arith.constant 0 : i32
    %c0_i32_1 = arith.constant 0 : i32
    return %c0_i32, %c0_i32_0 : i32, i32
  }
  func.func @transform_2(%arg0: i32) -> (i32, i32) {
    %c0_i32 = arith.constant 0 : i32
    %c0_i32_0 = arith.constant 0 : i32
    %c0_i32_1 = arith.constant 0 : i32
    return %c0_i32, %c0_i32_0 : i32, i32
  }
  func.func @transform_3(%arg0: i32) -> (i32, i32) {
    %c0_i32 = arith.constant 0 : i32
    %c0_i32_0 = arith.constant 0 : i32
    %c0_i32_1 = arith.constant 0 : i32
    return %c0_i32, %c0_i32_0 : i32, i32
  }
  func.func @transform_4(%arg0: i32) -> (i32, i32) {
    %c0_i32 = arith.constant 0 : i32
    %c0_i32_0 = arith.constant 0 : i32
    %c0_i32_1 = arith.constant 0 : i32
    return %c0_i32, %c0_i32_0 : i32, i32
  }
  func.func @transform_5(%arg0: i32) -> (i32, i32) {
    %c0_i32 = arith.constant 0 : i32
    %c0_i32_0 = arith.constant 0 : i32
    %c0_i32_1 = arith.constant 0 : i32
    return %c0_i32, %c0_i32_0 : i32, i32
  }
  func.func @transform_6(%arg0: i32) -> (i32, i32) {
    %c0_i32 = arith.constant 0 : i32
    %c0_i32_0 = arith.constant 0 : i32
    %c0_i32_1 = arith.constant 0 : i32
    return %c0_i32, %c0_i32_0 : i32, i32
  }
  func.func @transform_7(%arg0: i32) -> (i32, i32) {
    %c0_i32 = arith.constant 0 : i32
    %c0_i32_0 = arith.constant 0 : i32
    return %arg0, %c0_i32 : i32, i32
  }
}

</mosaic_0001>

<bundles_post_ra>
// kernel: tpu_custom_call.1
= control target key start
LH: loop header
LB: loop body
LE: loop exit
PB: predicated region body
PF: predicated region fallthrough
CT: control target
= control target key end

     0   :  { %13 = vsyncpa [#allocation4], 0  ;;  %s509_s0 = inlined_call_operand.hbm [shape: f32[16,16], index: 0, kind: input, shape index: {}]   ;;  %s510_s1 = inlined_call_operand.hbm [shape: f32[16,128], index: 1, kind: input, shape index: {}]   ;;  %s511_s2 = inlined_call_operand.vmem [shape: f32[1,128], index: 2, kind: input, shape index: {}]   ;;  %s512_s3 = inlined_call_operand.hbm [shape: f32[128,128], index: 3, kind: input, shape index: {}]   ;;  %s513_s4 = inlined_call_operand.vmem [shape: f32[1,128], index: 4, kind: input, shape index: {}]   ;;  %s514_s5 = inlined_call_operand.vmem [shape: f32[1,128], index: 5, kind: input, shape index: {}]   ;;  %s515_s6 = inlined_call_operand.<no memory space> [shape: f32[1,1], index: 6, kind: input, shape index: {}]   ;;  %s516_s7 = inlined_call_operand.vmem [shape: f32[16,1], index: 7, kind: output, shape index: {}]  }
   0x1   :  { %14 = vsyncpa [#allocation6], 0  ;;  %s435_s24 = smov [#allocation5]   ;;  %s436_s26 = smov [#allocation3]  }
   0x2   :  { %s32_s25 = sshll.u32 %s435_s24, 4  ;;  %s20_s27 = sshll.u32 %s436_s26, 4  ;;  %s33_s25 = int_to_ptr.vmem [resolvable:$true] %s32_s25  ;;  %s21_s27 = int_to_ptr.vmem [resolvable:$true] %s20_s27 }
   0x3   :  { %s379_s28 = scalar_lea.vmem %s33_s25, 256  ;;  %p384_p1 = scmp.lt.s32.totalorder %s33_s25, %s33_s25 }
   0x4   :  { %p380_p0 = scmp.ne.s32.totalorder %s33_s25, %s379_s28  ;;  %p385_p2 = scmp.lt.s32.totalorder %s379_s28, %s379_s28 }
   0x6   :  { %p386_p3 = por %p385_p2, %p384_p1 }
   0x8   :  { %p387_p4 = pnand %p386_p3, %p380_p0 }
   0xa   :  { %390 = shalt.err (!%p387_p4)
}
   0xb   :  { %s437_s29 = smov 128   ;;  %s438_s30 = smov 8  }
   0xc   :  { %38 = dma.hbm_to_vmem [thread:$0]  %s510_s1, 256, %s33_s25, [#allocation6], %s437_s29, %s437_s29, %s438_s30  }
   0xd   :  { %s399_s10 = scalar_lea.vmem %s21_s27, 256  ;;  %p404_p6 = scmp.lt.s32.totalorder %s21_s27, %s21_s27 }
   0xe   :  { %p400_p5 = scmp.ne.s32.totalorder %s21_s27, %s399_s10  ;;  %p405_p7 = scmp.lt.s32.totalorder %s399_s10, %s399_s10 }
  0x10   :  { %p406_p8 = por %p405_p7, %p404_p6 }
  0x12   :  { %p407_p9 = pnand %p406_p8, %p400_p5 }
  0x14   :  { %410 = shalt.err (!%p407_p9)
}
  0x15   :  { %26 = dma.hbm_to_vmem [thread:$0]  %s509_s0, 256, %s21_s27, [#allocation4], %s437_s29, %s437_s29, %s438_s30  }
  0x16   :  { %s439_s13 = smov [#allocation7]  }
  0x17   :  { %s46_s14 = sshll.u32 %s439_s13, 4  ;;  %s47_s14 = int_to_ptr.vmem [resolvable:$true] %s46_s14 }
  0x18   :  { %s419_s15 = scalar_lea.vmem %s47_s14, 2048  ;;  %p424_p11 = scmp.lt.s32.totalorder %s47_s14, %s47_s14 }
  0x19   :  { %p420_p10 = scmp.ne.s32.totalorder %s47_s14, %s419_s15  ;;  %p425_p12 = scmp.lt.s32.totalorder %s419_s15, %s419_s15 }
  0x1b   :  { %p426_p13 = por %p425_p12, %p424_p11 }
  0x1d   :  { %p427_p0 = pnand %p426_p13, %p420_p10 }
  0x1f   :  { %430 = shalt.err (!%p427_p0)
}
  0x20   :  { %52 = dma.hbm_to_vmem [thread:$0]  %s512_s3, 2048, %s47_s14, [#allocation6], %s437_s29, %s437_s29, %s438_s30  }
  0x21   :  { %431 = dma.done.wait [#allocation4], 256  }
  0x22   :  { %432 = vsyncadd [#allocation4], 4294967040 }
  0x23   :  { %433 = dma.done.wait [#allocation6], 2304  }
  0x24   :  { %434 = vsyncadd [#allocation6], 4294964992  ;;  %vm79_vm0 = vcmask 130048   ;;  %v71_v0 = vld [vmem:[#allocation5 + $0x8] sm:$0xff]  ;;  %v70_v1 = vld [vmem:[#allocation5] sm:$0xff]  ;;  %v285_v41 = vstv %s515_s6  ;;  %vm288_vm5 = vcmask 7168  }
  0x25   :  { %v68_v2 = vld [vmem:[#allocation3] sm:$0xff]  ;;  %324 = vmatprep.subr.mxu0 %v71_v0  ;;  %v182_v3 = vld [vmem:[#allocation7 + $0x78] sm:$0xff]  ;;  %v181_v4 = vld [vmem:[#allocation7 + $0x70] sm:$0xff] }
  0x26   :  { %328 = vmatprep.mubr.msk.f32.mxu0 %vm79_vm0, %v68_v2  ;;  %325 = vmatpush3.msra.mxu0 %v71_v0  ;;  %v69_v5 = vld [vmem:[#allocation3 + $0x8] sm:$0xff]  ;;  %v179_v7 = vld [vmem:[#allocation7 + $0x60] sm:$0xff]  ;;  %v178_v8 = vld [vmem:[#allocation7 + $0x58] sm:$0xff] }
  0x27   :  { %331 = vmatprep.subr.mxu1 %v182_v3  ;;  %326 = vmatprep.subr.mxu0 %v70_v1  ;;  %v180_v6 = vld [vmem:[#allocation7 + $0x68] sm:$0xff]  ;;  %v177_v9 = vld [vmem:[#allocation7 + $0x50] sm:$0xff]  ;;  %v175_v11 = vld [vmem:[#allocation7 + $0x40] sm:$0xff] }
  0x28   :  { %332 = vmatpush3.msra.mxu1 %v182_v3  ;;  %327 = vmatpush3.msra.mxu0 %v70_v1  ;;  %v176_v10 = vld [vmem:[#allocation7 + $0x48] sm:$0xff]  ;;  %v174_v12 = vld [vmem:[#allocation7 + $0x38] sm:$0xff]  ;;  %v173_v13 = vld [vmem:[#allocation7 + $0x30] sm:$0xff] }
  0x29   :  { %333 = vmatprep.subr.mxu1 %v181_v4  ;;  %329 = vmatmul.mubr.msk.f32.vlgmr.msra.gmra.mxu0 %vm79_vm0, %v69_v5  ;;  %v172_v14 = vld [vmem:[#allocation7 + $0x28] sm:$0xff]  ;;  %v171_v15 = vld [vmem:[#allocation7 + $0x20] sm:$0xff]  ;;  %v170_v16 = vld [vmem:[#allocation7 + $0x18] sm:$0xff] }
  0x2a   :  { %334 = vmatpush3.msra.mxu1 %v181_v4  ;;  %v169_v17 = vld [vmem:[#allocation7 + $0x10] sm:$0xff]  ;;  %v168_v18 = vld [vmem:[#allocation7 + $0x8] sm:$0xff]  ;;  %v167_v19 = vld [vmem:[#allocation7] sm:$0xff] }
  0x2b   :  { %335 = vmatprep.subr.mxu1 %v180_v6  ;;  %v297_v20 = vld [vmem:[%s511_s2] ss:$0 sm:$0xff] }
  0x2c   :  { %336 = vmatpush3.msra.mxu1 %v180_v6  ;;  %v300_v29 = vld [vmem:[%s513_s4] ss:$0 sm:$0xff] }
  0x2d   :  { %337 = vmatprep.subr.mxu1 %v179_v7  ;;  %v301_v37 = vld [vmem:[%s514_s5] ss:$0 sm:$0xff] }
  0x2e   :  { %338 = vmatpush3.msra.mxu1 %v179_v7 }
  0x2f   :  { %339 = vmatprep.subr.mxu1 %v178_v8 }
  0x30   :  { %340 = vmatpush3.msra.mxu1 %v178_v8 }
  0x31   :  { %341 = vmatprep.subr.mxu1 %v177_v9 }
  0x32   :  { %342 = vmatpush3.msra.mxu1 %v177_v9 }
  0x33   :  { %343 = vmatprep.subr.mxu1 %v176_v10 }
  0x34   :  { %344 = vmatpush3.msra.mxu1 %v176_v10 }
  0x35   :  { %345 = vmatprep.subr.mxu1 %v175_v11 }
  0x36   :  { %346 = vmatpush3.msra.mxu1 %v175_v11 }
  0x37   :  { %347 = vmatprep.subr.mxu1 %v174_v12 }
  0x38   :  { %348 = vmatpush3.msra.mxu1 %v174_v12 }
  0x39   :  { %349 = vmatprep.subr.mxu1 %v173_v13 }
  0x3a   :  { %350 = vmatpush3.msra.mxu1 %v173_v13 }
  0x3b   :  { %351 = vmatprep.subr.mxu1 %v172_v14 }
  0x3c   :  { %352 = vmatpush3.msra.mxu1 %v172_v14 }
  0x3d   :  { %353 = vmatprep.subr.mxu1 %v171_v15 }
  0x3e   :  { %354 = vmatpush3.msra.mxu1 %v171_v15 }
  0x3f   :  { %355 = vmatprep.subr.mxu1 %v170_v16 }
  0x40   :  { %356 = vmatpush3.msra.mxu1 %v170_v16 }
  0x41   :  { %357 = vmatprep.subr.mxu1 %v169_v17 }
  0x42   :  { %358 = vmatpush3.msra.mxu1 %v169_v17 }
  0x43   :  { %359 = vmatprep.subr.mxu1 %v168_v18 }
  0x44   :  { %360 = vmatpush3.msra.mxu1 %v168_v18 }
  0x45   :  { %361 = vmatprep.subr.mxu1 %v167_v19 }
  0x46   :  { %362 = vmatpush3.msra.mxu1 %v167_v19 }
  0xe9   :  { %v330_v21 = vpop.f32.mrf.mxu0 }
  0xea   :  { %v158_v22 = vadd.f32 %v330_v21, %v297_v20 }
  0xeb   :  { %v152_v23 = vpop.f32.mrf.mxu0 }
  0xec   :  { %v153_v24 = vadd.f32 %v297_v20, %v152_v23  ;;  %v164_v25 = vmul.f32 0.01, %v158_v22  ;;  %vm162_vm2 = vcmp.ge.f32.partialorder %v158_v22, 0.0 }
  0xee   :  { %vm161_vm1 = vcmp.ge.f32.partialorder %v153_v24, 0.0  ;;  %v163_v26 = vmul.f32 0.01, %v153_v24  ;;  %v166_v28 = vsel %vm162_vm2, %v158_v22, %v164_v25 }
  0xf0   :  { %v165_v27 = vsel %vm161_vm1, %v153_v24, %v163_v26 }
  0xf1   :  { %363 = vmatprep.mubr.f32.mxu1 %v165_v27 }
  0xf2   :  { %364 = vmatmul.mubr.f32.vlgmr.msra.gmra.mxu1 %v166_v28 }
 0x1b2   :  { %v365_v30 = vpop.f32.mrf.mxu1 }
 0x1b3   :  { %v262_v31 = vadd.f32 %v365_v30, %v300_v29 }
 0x1b4   :  { %v256_v32 = vpop.f32.mrf.mxu1 }
 0x1b5   :  { %v257_v33 = vadd.f32 %v300_v29, %v256_v32  ;;  %v268_v34 = vmul.f32 0.01, %v262_v31  ;;  %vm266_vm4 = vcmp.ge.f32.partialorder %v262_v31, 0.0 }
 0x1b7   :  { %v267_v35 = vmul.f32 0.01, %v257_v33  ;;  %vm265_vm3 = vcmp.ge.f32.partialorder %v257_v33, 0.0  ;;  %v270_v39 = vsel %vm266_vm4, %v262_v31, %v268_v34 }
 0x1b8   :  { %v279_v40 = vmul.f32 %v301_v37, %v270_v39 }
 0x1b9   :  { %v269_v36 = vsel %vm265_vm3, %v257_v33, %v267_v35 }
 0x1ba   :  { %v278_v38 = vmul.f32 %v301_v37, %v269_v36 }
 0x1bc   :  { %280 = vadd.xlane.f32.xlu0 %v278_v38 }
 0x1c0   :  { %282 = vadd.xlane.f32.xlu0 %v279_v40 }
 0x245   :  { %v281_v42 = vpop.xlane.xlu0 %280 }
 0x246   :  { %v286_v43 = vadd.f32 %v285_v41, %v281_v42 }
 0x248   :  { %289 = vst.msk [vmem:[%s516_s7] sm:$0xff] %vm288_vm5, %v286_v43 }
 0x249   :  { %v283_v44 = vpop.xlane.xlu0 %282 }
 0x24a   :  { %v287_v45 = vadd.f32 %v285_v41, %v283_v44 }
 0x24c   :  { %290 = vst.msk [vmem:[%s516_s7 + $0x8] sm:$0xff] %vm288_vm5, %v287_v45 }
 0x24d   :  { %295 = vsyncpa [#allocation4], 1 }
 0x24e   :  { %296 = vsyncpa [#allocation6], 1 }

</bundles_post_ra>
